<compile_context>
chip_gen: v5e
topology: v5e:2x2
jax: 0.10.0
libtpu: 0.0.40
codegen_flags: <defaults>
</compile_context>

<pallas_src>
import functools

import jax
import jax.numpy as jnp
from jax.experimental import pallas as pl
from jax.experimental.pallas import tpu as pltpu


def _round_up(x, m):
    return (x + m - 1) // m * m


def ensemble_kernel(x_ref, w_ref, b_ref, out_ref, *, num_models, num_classes):
    """Single fused step over one batch tile.

    x_ref  : (TB, D)   bf16  batch tile of flattened images
    w_ref  : (D, NP)   bf16  packed per-model classifier weights, NP = pad(M*NC)
    b_ref  : (1, NP)   f32   packed per-model biases
    out_ref: (1, TB)   int32 argmax class ids (batch along lanes)
    """
    # One MXU pass produces logits for all ensemble members at once.
    logits = jnp.dot(
        x_ref[...], w_ref[...], preferred_element_type=jnp.float32
    ) + b_ref[...]

    tb = logits.shape[0]
    prob_sum = jnp.zeros((tb, num_classes), jnp.float32)
    for m in range(num_models):  # static unroll over lane slices of width NC
        z = logits[:, m * num_classes:(m + 1) * num_classes]
        z_max = jnp.max(z, axis=-1, keepdims=True)
        e = jnp.exp(z - z_max)
        denom = jnp.sum(e, axis=-1, keepdims=True)
        prob_sum = prob_sum + e * pl.reciprocal(denom, approx=True)

    # argmax over classes (first occurrence on ties, like jnp/torch argmax).
    # Division by num_models omitted: argmax is scale-invariant.
    mx = jnp.max(prob_sum, axis=-1, keepdims=True)
    idx = jax.lax.broadcasted_iota(jnp.int32, prob_sum.shape, dimension=1)
    cand = jnp.where(prob_sum == mx, idx, jnp.int32(2 ** 30))
    out_ref[...] = jnp.min(cand, axis=-1)[None, :]


def ensemble_forward(x_nchw, weights, biases, *, batch_block=128):
    """x_nchw: [B, C, H, W]; weights: [M, D, NC]; biases: [M, NC] -> int32 [B]."""
    B = x_nchw.shape[0]
    D = x_nchw.shape[1] * x_nchw.shape[2] * x_nchw.shape[3]
    M, D_w, NC = weights.shape
    assert D == D_w

    # Pack the model axis into the matmul N dimension, lane-pad to 128.
    n_packed = M * NC
    n_pad = _round_up(n_packed, 128)
    w2 = weights.transpose(1, 0, 2).reshape(D, n_packed)
    w2 = jnp.pad(w2, ((0, 0), (0, n_pad - n_packed))).astype(jnp.bfloat16)
    b2 = jnp.pad(
        biases.reshape(1, n_packed), ((0, 0), (0, n_pad - n_packed))
    ).astype(jnp.float32)
    x_flat = x_nchw.reshape(B, D).astype(jnp.bfloat16)

    tb = B if B <= batch_block else batch_block
    assert B % tb == 0, "batch must be divisible by the batch tile"
    grid = (B // tb,)

    kernel = functools.partial(ensemble_kernel, num_models=M, num_classes=NC)

    # TODO(synk): for production sizes (NC~1000, real-image D) add a D
    # (contraction) grid axis with (tk, n_pad) weight tiles + a VMEM logits
    # accumulator so the weight block fits v7x's 64 MiB VMEM.
    out = pl.pallas_call(
        kernel,
        out_shape=jax.ShapeDtypeStruct((1, B), jnp.int32),
        grid_spec=pltpu.PrefetchScalarGridSpec(
            num_scalar_prefetch=0,
            grid=grid,
            in_specs=[
                pl.BlockSpec((tb, D), lambda i: (i, 0)),      # batch-tiled x
                pl.BlockSpec((D, n_pad), lambda i: (0, 0)),   # resident packed W
                pl.BlockSpec((1, n_pad), lambda i: (0, 0)),   # resident packed b
            ],
            out_specs=pl.BlockSpec((1, tb), lambda i: (0, i)),  # lane-dense out
        ),
        compiler_params=pltpu.CompilerParams(
            dimension_semantics=("parallel",),
        ),
    )(x_flat, w2, b2)
    return out.reshape(B)


def ensemble_reference(x_nchw, weights, biases):
    """Pure-JAX reference for the torch forward.

    Uses the same bf16 input/weight cast as the kernel so the dtype handling
    (the only intentional deviation from f32 torch math) is matched.
    """
    B = x_nchw.shape[0]
    x_flat = x_nchw.reshape(B, -1).astype(jnp.bfloat16)
    w = weights.astype(jnp.bfloat16)
    logits = jnp.einsum(
        "bd,mdc->mbc", x_flat, w, preferred_element_type=jnp.float32
    ) + biases[:, None, :].astype(jnp.float32)
    probs = jax.nn.softmax(logits, axis=-1)   # softmax over classes
    mean_p = jnp.mean(probs, axis=0)          # mean over models
    return jnp.argmax(mean_p, axis=-1).astype(jnp.int32)


if __name__ == "__main__":
    # Small, deterministic synthetic setup.
    B, C, H, W = 2, 4, 16, 16      # input image batch (NCHW)
    NUM_CLASSES = 32
    NUM_MODELS = 3                 # ensemble size
    D = C * H * W

    key = jax.random.PRNGKey(0)
    kx, kw, kb = jax.random.split(key, 3)

    x = jax.random.normal(kx, (B, C, H, W), dtype=jnp.float32)
    weights = 0.05 * jax.random.normal(
        kw, (NUM_MODELS, D, NUM_CLASSES), dtype=jnp.float32
    )
    biases = 0.1 * jax.random.normal(
        kb, (NUM_MODELS, NUM_CLASSES), dtype=jnp.float32
    )

    preds = jax.block_until_ready(ensemble_forward(x, weights, biases))
    ref = jax.block_until_ready(ensemble_reference(x, weights, biases))

    assert preds.shape == (B,)
    assert bool(jnp.all(preds == ref)), (preds, ref)
    print("KERNEL_OK")
</pallas_src>

<mosaic_0001>
module attributes {stable_mosaic.version = 11 : i64} {
  func.func @ensemble_kernel(%arg0: i32, %arg1: memref<2x1024xbf16, #tpu.memory_space<vmem>>, %arg2: memref<1024x128xbf16, #tpu.memory_space<vmem>>, %arg3: memref<1x128xf32, #tpu.memory_space<vmem>>, %arg4: memref<1x2xi32, #tpu.memory_space<vmem>>) attributes {dimension_semantics = [#tpu.dimension_semantics<parallel>], iteration_bounds = array<i64: 1>, scalar_prefetch = 0 : i64, scratch_operands = 0 : i64, tpu.core_type = #tpu.core_type<tc>, window_params = [{transform_indices = @transform_0, window_bounds = array<i64: 2, 1024>}, {pipeline_mode = #tpu.pipeline_mode<synchronous>, transform_indices = @transform_1, window_bounds = array<i64: 1024, 128>}, {pipeline_mode = #tpu.pipeline_mode<synchronous>, transform_indices = @transform_2, window_bounds = array<i64: 1, 128>}, {transform_indices = @transform_3, window_bounds = array<i64: 1, 2>}]} {
    %c0 = arith.constant 0 : index
    %c0_0 = arith.constant 0 : index
    %0 = vector.load %arg1[%c0, %c0_0] : memref<2x1024xbf16, #tpu.memory_space<vmem>>, vector<2x1024xbf16>
    %c0_1 = arith.constant 0 : index
    %c0_2 = arith.constant 0 : index
    %1 = vector.load %arg2[%c0_1, %c0_2] : memref<1024x128xbf16, #tpu.memory_space<vmem>>, vector<1024x128xbf16>
    %cst = arith.constant dense<0.000000e+00> : vector<2x128xf32>
    %2 = tpu.matmul %0, %1, %cst {dimension_numbers = #tpu.dot_dimension_numbers<[1], [0], [0], [1], [0, 0, 1, 1], [], []>} : vector<2x1024xbf16>, vector<1024x128xbf16>, vector<2x128xf32> -> vector<2x128xf32>
    %c0_3 = arith.constant 0 : index
    %c0_4 = arith.constant 0 : index
    %3 = vector.load %arg3[%c0_3, %c0_4] : memref<1x128xf32, #tpu.memory_space<vmem>>, vector<1x128xf32>
    %4 = vector.broadcast %3 : vector<1x128xf32> to vector<2x128xf32>
    %5 = arith.addf %2, %4 : vector<2x128xf32>
    %cst_5 = arith.constant 0.000000e+00 : f32
    %6 = vector.broadcast %cst_5 : f32 to vector<2x32xf32>
    %7 = vector.extract_strided_slice %5 {offsets = [0, 0], sizes = [2, 32], strides = [1, 1]} : vector<2x128xf32> to vector<2x32xf32>
    %cst_6 = arith.constant dense<0xFF800000> : vector<2xf32>
    %8 = vector.multi_reduction <maximumf>, %7, %cst_6 [1] : vector<2x32xf32> to vector<2xf32>
    %9 = vector.shape_cast %8 : vector<2xf32> to vector<2x1xf32>
    %10 = vector.broadcast %9 : vector<2x1xf32> to vector<2x32xf32>
    %11 = arith.subf %7, %10 : vector<2x32xf32>
    %12 = math.exp %11 : vector<2x32xf32>
    %cst_7 = arith.constant dense<0.000000e+00> : vector<2xf32>
    %13 = vector.multi_reduction <add>, %12, %cst_7 [1] : vector<2x32xf32> to vector<2xf32>
    %14 = vector.shape_cast %13 : vector<2xf32> to vector<2x1xf32>
    %15 = tpu.reciprocal %14 {approx = true} : vector<2x1xf32> -> vector<2x1xf32>
    %16 = vector.broadcast %15 : vector<2x1xf32> to vector<2x32xf32>
    %17 = arith.mulf %12, %16 : vector<2x32xf32>
    %18 = arith.addf %6, %17 : vector<2x32xf32>
    %19 = vector.extract_strided_slice %5 {offsets = [0, 32], sizes = [2, 32], strides = [1, 1]} : vector<2x128xf32> to vector<2x32xf32>
    %cst_8 = arith.constant dense<0xFF800000> : vector<2xf32>
    %20 = vector.multi_reduction <maximumf>, %19, %cst_8 [1] : vector<2x32xf32> to vector<2xf32>
    %21 = vector.shape_cast %20 : vector<2xf32> to vector<2x1xf32>
    %22 = vector.broadcast %21 : vector<2x1xf32> to vector<2x32xf32>
    %23 = arith.subf %19, %22 : vector<2x32xf32>
    %24 = math.exp %23 : vector<2x32xf32>
    %cst_9 = arith.constant dense<0.000000e+00> : vector<2xf32>
    %25 = vector.multi_reduction <add>, %24, %cst_9 [1] : vector<2x32xf32> to vector<2xf32>
    %26 = vector.shape_cast %25 : vector<2xf32> to vector<2x1xf32>
    %27 = tpu.reciprocal %26 {approx = true} : vector<2x1xf32> -> vector<2x1xf32>
    %28 = vector.broadcast %27 : vector<2x1xf32> to vector<2x32xf32>
    %29 = arith.mulf %24, %28 : vector<2x32xf32>
    %30 = arith.addf %18, %29 : vector<2x32xf32>
    %31 = vector.extract_strided_slice %5 {offsets = [0, 64], sizes = [2, 32], strides = [1, 1]} : vector<2x128xf32> to vector<2x32xf32>
    %cst_10 = arith.constant dense<0xFF800000> : vector<2xf32>
    %32 = vector.multi_reduction <maximumf>, %31, %cst_10 [1] : vector<2x32xf32> to vector<2xf32>
    %33 = vector.shape_cast %32 : vector<2xf32> to vector<2x1xf32>
    %34 = vector.broadcast %33 : vector<2x1xf32> to vector<2x32xf32>
    %35 = arith.subf %31, %34 : vector<2x32xf32>
    %36 = math.exp %35 : vector<2x32xf32>
    %cst_11 = arith.constant dense<0.000000e+00> : vector<2xf32>
    %37 = vector.multi_reduction <add>, %36, %cst_11 [1] : vector<2x32xf32> to vector<2xf32>
    %38 = vector.shape_cast %37 : vector<2xf32> to vector<2x1xf32>
    %39 = tpu.reciprocal %38 {approx = true} : vector<2x1xf32> -> vector<2x1xf32>
    %40 = vector.broadcast %39 : vector<2x1xf32> to vector<2x32xf32>
    %41 = arith.mulf %36, %40 : vector<2x32xf32>
    %42 = arith.addf %30, %41 : vector<2x32xf32>
    %cst_12 = arith.constant dense<0xFF800000> : vector<2xf32>
    %43 = vector.multi_reduction <maximumf>, %42, %cst_12 [1] : vector<2x32xf32> to vector<2xf32>
    %44 = vector.shape_cast %43 : vector<2xf32> to vector<2x1xf32>
    %45 = tpu.iota {dimensions = array<i32: 1>} : vector<2x32xi32>
    %46 = vector.broadcast %44 : vector<2x1xf32> to vector<2x32xf32>
    %47 = arith.cmpf oeq, %42, %46 : vector<2x32xf32>
    %c1073741824_i32 = arith.constant 1073741824 : i32
    %48 = vector.broadcast %c1073741824_i32 : i32 to vector<2x32xi32>
    %49 = arith.select %47, %45, %48 : vector<2x32xi1>, vector<2x32xi32>
    %cst_13 = arith.constant dense<2147483647> : vector<2xi32>
    %50 = vector.multi_reduction <minsi>, %49, %cst_13 [1] : vector<2x32xi32> to vector<2xi32>
    %51 = vector.shape_cast %50 : vector<2xi32> to vector<1x2xi32>
    %c0_14 = arith.constant 0 : index
    %c0_15 = arith.constant 0 : index
    %52 = vector.load %arg4[%c0_14, %c0_15] : memref<1x2xi32, #tpu.memory_space<vmem>>, vector<1x2xi32>
    tpu.vector_store %arg4[%c0_14, %c0_15], %51 {strides = array<i32>} : memref<1x2xi32, #tpu.memory_space<vmem>>, vector<1x2xi32>,
    return
  }
  func.func @transform_0(%arg0: i32) -> (i32, i32) {
    %c0_i32 = arith.constant 0 : i32
    %c0_i32_0 = arith.constant 0 : i32
    return %arg0, %c0_i32 : i32, i32
  }
  func.func @transform_1(%arg0: i32) -> (i32, i32) {
    %c0_i32 = arith.constant 0 : i32
    %c0_i32_0 = arith.constant 0 : i32
    %c0_i32_1 = arith.constant 0 : i32
    return %c0_i32, %c0_i32_0 : i32, i32
  }
  func.func @transform_2(%arg0: i32) -> (i32, i32) {
    %c0_i32 = arith.constant 0 : i32
    %c0_i32_0 = arith.constant 0 : i32
    %c0_i32_1 = arith.constant 0 : i32
    return %c0_i32, %c0_i32_0 : i32, i32
  }
  func.func @transform_3(%arg0: i32) -> (i32, i32) {
    %c0_i32 = arith.constant 0 : i32
    %c0_i32_0 = arith.constant 0 : i32
    return %c0_i32, %arg0 : i32, i32
  }
}

</mosaic_0001>

<bundles_post_ra>
// kernel: tpu_custom_call.1
= control target key start
LH: loop header
LB: loop body
LE: loop exit
PB: predicated region body
PF: predicated region fallthrough
CT: control target
= control target key end

     0   :  { %8 = vsyncpa [#allocation3], 0  ;;  %s1247_s0 = inlined_call_operand.hbm [shape: bf16[2,1024], index: 0, kind: input, shape index: {}]   ;;  %s1248_s1 = inlined_call_operand.hbm [shape: bf16[1024,128], index: 1, kind: input, shape index: {}]   ;;  %s1249_s2 = inlined_call_operand.vmem [shape: f32[1,128], index: 2, kind: input, shape index: {}]   ;;  %s1250_s3 = inlined_call_operand.hbm [shape: s32[1,2], index: 3, kind: output, shape index: {}]  }
   0x1   :  { %9 = vsyncpa [#allocation6], 0 }
   0x2   :  { %10 = vsyncpa [#allocation4], 0  ;;  %s16_s14 = sshll.u32 %s1247_s0, 4  ;;  %s1199_s15 = smov [#allocation2]   ;;  %s17_s14 = int_to_ptr.hbm [resolvable:$true] %s16_s14 }
   0x3   :  { %s18_s16 = sshll.u32 %s1199_s15, 4  ;;  %s26_s19 = sshll.u32 %s1248_s1, 4  ;;  %s19_s16 = int_to_ptr.vmem [resolvable:$true] %s18_s16  ;;  %s27_s19 = int_to_ptr.hbm [resolvable:$true] %s26_s19 }
   0x4   :  { %21 = dma.hbm_to_vmem [thread:$0]  %s17_s14, 128, %s19_s16, [#allocation3]  }
   0x5   :  { %s1200_s20 = smov [#allocation5]   ;;  %s1201_s22 = smov 64  }
   0x6   :  { %s28_s21 = sshll.u32 %s1200_s20, 4  ;;  %s1202_s23 = smov 4   ;;  %s29_s21 = int_to_ptr.vmem [resolvable:$true] %s28_s21 }
   0x7   :  { %34 = dma.hbm_to_vmem [thread:$0]  %s27_s19, 8192, %s29_s21, [#allocation6], %s1201_s22, %s1201_s22, %s1202_s23  }
   0x8   :  { %1193 = dma.done.wait [#allocation3], 128  }
   0x9   :  { %1194 = vsyncadd [#allocation3], 4294967168 }
   0xa   :  { %1195 = dma.done.wait [#allocation6], 8192  }
   0xb   :  { %1196 = vsyncadd [#allocation6], 4294959104  ;;  %v1045_v0 = vld [vmem:[#allocation5 + $0x38] sm:$0xff]  ;;  %v1044_v4 = vld [vmem:[#allocation5 + $0x30] sm:$0xff]  ;;  %vm697_vm0 = vcmask 517376   ;;  %vm684_vm1 = vcmask 254976  }
   0xc   :  { %v1053_v1 = vld [vmem:[#allocation5 + $0x78] sm:$0xff]  ;;  %580 = vmatpush.bf16.msra.mxu0 %v1045_v0  ;;  %v1052_v5 = vld [vmem:[#allocation5 + $0x70] sm:$0xff]  ;;  %v1043_v8 = vld [vmem:[#allocation5 + $0x28] sm:$0xff]  ;;  %vm718_vm2 = vcmask 779776   ;;  %s1204_s24 = smov [#allocation7]   ;;  %s771_s28 = sshll.u32 %s1250_s3, 4  ;;  %s772_s28 = int_to_ptr.hbm [resolvable:$true] %s771_s28 }
   0xd   :  { %v1061_v2 = vld [vmem:[#allocation5 + $0xb8] sm:$0xff]  ;;  %593 = vmatpush.bf16.msra.mxu1 %v1053_v1  ;;  %v1060_v6 = vld [vmem:[#allocation5 + $0xb0] sm:$0xff]  ;;  %v1051_v9 = vld [vmem:[#allocation5 + $0x68] sm:$0xff]  ;;  %s769_s25 = sshll.u32 %s1204_s24, 4  ;;  %vm762_vm5 = vcmask 8192   ;;  %s770_s25 = int_to_ptr.vmem [resolvable:$true] %s769_s25 }
   0xe   :  { %v1069_v3 = vld [vmem:[#allocation5 + $0xf8] sm:$0xff]  ;;  %606 = vmatpush.bf16.msra.mxu2 %v1061_v2  ;;  %v1068_v7 = vld [vmem:[#allocation5 + $0xf0] sm:$0xff]  ;;  %v1059_v10 = vld [vmem:[#allocation5 + $0xa8] sm:$0xff] }
   0xf   :  { %619 = vmatpush.bf16.msra.mxu3 %v1069_v3  ;;  %v1067_v11 = vld [vmem:[#allocation5 + $0xe8] sm:$0xff]  ;;  %v1042_v12 = vld [vmem:[#allocation5 + $0x20] sm:$0xff]  ;;  %v45_v16 = vld [vmem:[#allocation2] sm:$0xff] }
  0x10   :  { %581 = vmatpush.bf16.msra.mxu0 %v1044_v4  ;;  %v1050_v13 = vld [vmem:[#allocation5 + $0x60] sm:$0xff]  ;;  %v1041_v17 = vld [vmem:[#allocation5 + $0x18] sm:$0xff]  ;;  %179 = vst [vmem:[#allocation1] ss:$9 sm:$0xff] %v45_v16  ;;  %v1040_v21 = vld [vmem:[#allocation5 + $0x10] sm:$0xff] }
  0x11   :  { %594 = vmatpush.bf16.msra.mxu1 %v1052_v5  ;;  %v1058_v14 = vld [vmem:[#allocation5 + $0xa0] sm:$0xff]  ;;  %v1049_v18 = vld [vmem:[#allocation5 + $0x58] sm:$0xff]  ;;  %v1048_v22 = vld [vmem:[#allocation5 + $0x50] sm:$0xff] }
  0x12   :  { %607 = vmatpush.bf16.msra.mxu2 %v1060_v6  ;;  %v1066_v15 = vld [vmem:[#allocation5 + $0xe0] sm:$0xff]  ;;  %v1057_v19 = vld [vmem:[#allocation5 + $0x98] sm:$0xff]  ;;  %v1056_v23 = vld [vmem:[#allocation5 + $0x90] sm:$0xff] }
  0x13   :  { %620 = vmatpush.bf16.msra.mxu3 %v1068_v7  ;;  %v1065_v20 = vld [vmem:[#allocation5 + $0xd8] sm:$0xff]  ;;  %v1064_v24 = vld [vmem:[#allocation5 + $0xd0] sm:$0xff]  ;;  %v1039_v25 = vld [vmem:[#allocation5 + $0x8] sm:$0xff] }
  0x14   :  { %582 = vmatpush.bf16.msra.mxu0 %v1043_v8  ;;  %v1047_v26 = vld [vmem:[#allocation5 + $0x48] sm:$0xff]  ;;  %v1038_v29 = vld [vmem:[#allocation5] sm:$0xff]  ;;  %v1077_v33 = vld [vmem:[#allocation5 + $0x138] sm:$0xff] }
  0x15   :  { %595 = vmatpush.bf16.msra.mxu1 %v1051_v9  ;;  %v1055_v27 = vld [vmem:[#allocation5 + $0x88] sm:$0xff]  ;;  %v1046_v30 = vld [vmem:[#allocation5 + $0x40] sm:$0xff]  ;;  %v1085_v34 = vld [vmem:[#allocation5 + $0x178] sm:$0xff] }
  0x16   :  { %608 = vmatpush.bf16.msra.mxu2 %v1059_v10  ;;  %v1063_v28 = vld [vmem:[#allocation5 + $0xc8] sm:$0xff]  ;;  %v1054_v31 = vld [vmem:[#allocation5 + $0x80] sm:$0xff]  ;;  %v1093_v35 = vld [vmem:[#allocation5 + $0x1b8] sm:$0xff] }
  0x17   :  { %621 = vmatpush.bf16.msra.mxu3 %v1067_v11  ;;  %v1062_v32 = vld [vmem:[#allocation5 + $0xc0] sm:$0xff]  ;;  %v1101_v36 = vld [vmem:[#allocation5 + $0x1f8] sm:$0xff]  ;;  %v1076_v37 = vld [vmem:[#allocation5 + $0x130] sm:$0xff] }
  0x18   :  { %583 = vmatpush.bf16.msra.mxu0 %v1042_v12  ;;  %v182_v38 = vld [vmem:[#allocation1 + $0x12] sm:$0xff]  ;;  %v180_v39 = vld [vmem:[#allocation1] sm:$0xff]  ;;  %v181_v42 = vld [vmem:[#allocation1 + $0x9] sm:$0xff] }
  0x19   :  { %596 = vmatpush.bf16.msra.mxu1 %v1050_v13  ;;  %v1084_v40 = vld [vmem:[#allocation5 + $0x170] sm:$0xff]  ;;  %v1075_v45 = vld [vmem:[#allocation5 + $0x128] sm:$0xff]  ;;  %v1074_v49 = vld [vmem:[#allocation5 + $0x120] sm:$0xff] }
  0x1a   :  { %609 = vmatpush.bf16.msra.mxu2 %v1058_v14  ;;  %v183_v41 = vld [vmem:[#allocation1 + $0x1b] sm:$0xff]  ;;  %v1082_v50 = vld [vmem:[#allocation5 + $0x160] sm:$0xff]  ;;  %v1073_v53 = vld [vmem:[#allocation5 + $0x118] sm:$0xff] }
  0x1b   :  { %622 = vmatpush.bf16.msra.mxu3 %v1066_v15  ;;  %v1092_v43 = vld [vmem:[#allocation5 + $0x1b0] sm:$0xff]  ;;  %v1083_v46 = vld [vmem:[#allocation5 + $0x168] sm:$0xff]  ;;  %v1090_v51 = vld [vmem:[#allocation5 + $0x1a0] sm:$0xff] }
  0x1c   :  { %584 = vmatpush.bf16.msra.mxu0 %v1041_v17  ;;  %v1100_v44 = vld [vmem:[#allocation5 + $0x1f0] sm:$0xff]  ;;  %v1091_v47 = vld [vmem:[#allocation5 + $0x1a8] sm:$0xff]  ;;  %v1098_v52 = vld [vmem:[#allocation5 + $0x1e0] sm:$0xff] }
  0x1d   :  { %597 = vmatpush.bf16.msra.mxu1 %v1049_v18  ;;  %v1099_v48 = vld [vmem:[#allocation5 + $0x1e8] sm:$0xff]  ;;  %v1081_v54 = vld [vmem:[#allocation5 + $0x158] sm:$0xff]  ;;  %v1072_v57 = vld [vmem:[#allocation5 + $0x110] sm:$0xff] }
  0x1e   :  { %610 = vmatpush.bf16.msra.mxu2 %v1057_v19  ;;  %v1089_v55 = vld [vmem:[#allocation5 + $0x198] sm:$0xff]  ;;  %v1080_v58 = vld [vmem:[#allocation5 + $0x150] sm:$0xff]  ;;  %v1071_v61 = vld [vmem:[#allocation5 + $0x108] sm:$0xff] }
  0x1f   :  { %623 = vmatpush.bf16.msra.mxu3 %v1065_v20  ;;  %v1097_v56 = vld [vmem:[#allocation5 + $0x1d8] sm:$0xff]  ;;  %v1088_v59 = vld [vmem:[#allocation5 + $0x190] sm:$0xff]  ;;  %v1079_v62 = vld [vmem:[#allocation5 + $0x148] sm:$0xff] }
  0x20   :  { %585 = vmatpush.bf16.msra.mxu0 %v1040_v21  ;;  %v1096_v60 = vld [vmem:[#allocation5 + $0x1d0] sm:$0xff]  ;;  %v1087_v63 = vld [vmem:[#allocation5 + $0x188] sm:$0xff]  ;;  %v1070_v1 = vld [vmem:[#allocation5 + $0x100] sm:$0xff] }
  0x21   :  { %598 = vmatpush.bf16.msra.mxu1 %v1048_v22  ;;  %v1095_v0 = vld [vmem:[#allocation5 + $0x1c8] sm:$0xff]  ;;  %v1078_v2 = vld [vmem:[#allocation5 + $0x140] sm:$0xff]  ;;  %v184_v5 = vld [vmem:[#allocation1 + $0x24] sm:$0xff] }
  0x22   :  { %611 = vmatpush.bf16.msra.mxu2 %v1056_v23  ;;  %v1086_v3 = vld [vmem:[#allocation5 + $0x180] sm:$0xff]  ;;  %v187_v8 = vld [vmem:[#allocation1 + $0x3f] sm:$0xff] }
  0x23   :  { %624 = vmatpush.bf16.msra.mxu3 %v1064_v24  ;;  %v1094_v4 = vld [vmem:[#allocation5 + $0x1c0] sm:$0xff]  ;;  %v1108_v15 = vld [vmem:[%s1249_s2] ss:$0 sm:$0xff]  ;;  %s1203_s2 = smov 96  }
  0x24   :  { %586 = vmatpush.bf16.msra.mxu0 %v1039_v25  ;;  %v185_v6 = vld [vmem:[#allocation1 + $0x2d] sm:$0xff]  ;;  %v186_v7 = vld [vmem:[#allocation1 + $0x36] sm:$0xff] }
  0x25   :  { %599 = vmatpush.bf16.msra.mxu1 %v1047_v26 }
  0x26   :  { %612 = vmatpush.bf16.msra.mxu2 %v1055_v27 }
  0x27   :  { %625 = vmatpush.bf16.msra.mxu3 %v1063_v28 }
  0x28   :  { %587 = vmatpush.bf16.msra.mxu0 %v1038_v29 }
  0x29   :  { %600 = vmatpush.bf16.msra.mxu1 %v1046_v30 }
  0x2a   :  { %613 = vmatpush.bf16.msra.mxu2 %v1054_v31 }
  0x2b   :  { %626 = vmatpush.bf16.msra.mxu3 %v1062_v32  ;;  %588 = vmatmul.bf16.vlgmr.msra.gmra.mxu0 %v180_v39 }
  0x2c   :  { %632 = vmatpush.bf16.msrb.mxu0 %v1077_v33  ;;  %601 = vmatmul.bf16.vlgmr.msra.gmra.mxu1 %v181_v42 }
  0x2d   :  { %645 = vmatpush.bf16.msrb.mxu1 %v1085_v34  ;;  %614 = vmatmul.bf16.vlgmr.msra.gmra.mxu2 %v182_v38 }
  0x2e   :  { %658 = vmatpush.bf16.msrb.mxu2 %v1093_v35  ;;  %627 = vmatmul.bf16.vlgmr.msra.gmra.mxu3 %v183_v41 }
  0x2f   :  { %671 = vmatpush.bf16.msrb.mxu3 %v1101_v36 }
  0x30   :  { %633 = vmatpush.bf16.msrb.mxu0 %v1076_v37 }
  0x31   :  { %646 = vmatpush.bf16.msrb.mxu1 %v1084_v40 }
  0x32   :  { %659 = vmatpush.bf16.msrb.mxu2 %v1092_v43 }
  0x33   :  { %672 = vmatpush.bf16.msrb.mxu3 %v1100_v44 }
  0x34   :  { %634 = vmatpush.bf16.msrb.mxu0 %v1075_v45 }
  0x35   :  { %647 = vmatpush.bf16.msrb.mxu1 %v1083_v46 }
  0x36   :  { %660 = vmatpush.bf16.msrb.mxu2 %v1091_v47 }
  0x37   :  { %673 = vmatpush.bf16.msrb.mxu3 %v1099_v48 }
  0x38   :  { %635 = vmatpush.bf16.msrb.mxu0 %v1074_v49 }
  0x39   :  { %648 = vmatpush.bf16.msrb.mxu1 %v1082_v50 }
  0x3a   :  { %661 = vmatpush.bf16.msrb.mxu2 %v1090_v51 }
  0x3b   :  { %674 = vmatpush.bf16.msrb.mxu3 %v1098_v52 }
  0x3c   :  { %636 = vmatpush.bf16.msrb.mxu0 %v1073_v53 }
  0x3d   :  { %649 = vmatpush.bf16.msrb.mxu1 %v1081_v54 }
  0x3e   :  { %662 = vmatpush.bf16.msrb.mxu2 %v1089_v55 }
  0x3f   :  { %675 = vmatpush.bf16.msrb.mxu3 %v1097_v56 }
  0x40   :  { %637 = vmatpush.bf16.msrb.mxu0 %v1072_v57 }
  0x41   :  { %650 = vmatpush.bf16.msrb.mxu1 %v1080_v58 }
  0x42   :  { %663 = vmatpush.bf16.msrb.mxu2 %v1088_v59 }
  0x43   :  { %676 = vmatpush.bf16.msrb.mxu3 %v1096_v60 }
  0x44   :  { %638 = vmatpush.bf16.msrb.mxu0 %v1071_v61 }
  0x45   :  { %651 = vmatpush.bf16.msrb.mxu1 %v1079_v62 }
  0x46   :  { %664 = vmatpush.bf16.msrb.mxu2 %v1087_v63 }
  0x47   :  { %677 = vmatpush.bf16.msrb.mxu3 %v1095_v0 }
  0x48   :  { %639 = vmatpush.bf16.msrb.mxu0 %v1070_v1 }
  0x49   :  { %652 = vmatpush.bf16.msrb.mxu1 %v1078_v2 }
  0x4a   :  { %665 = vmatpush.bf16.msrb.mxu2 %v1086_v3 }
  0x4b   :  { %678 = vmatpush.bf16.msrb.mxu3 %v1094_v4  ;;  %640 = vmatmul.bf16.vlgmr.msrb.gmra.mxu0 %v184_v5  ;;  %v742_v4 = vlaneseq }
  0x4c   :  { %653 = vmatmul.bf16.vlgmr.msrb.gmra.mxu1 %v185_v6 }
  0x4d   :  { %666 = vmatmul.bf16.vlgmr.msrb.gmra.mxu2 %v186_v7  ;;  %v743_v5 = vand.u32 127, %v742_v4 }
  0x4e   :  { %679 = vmatmul.bf16.vlgmr.msrb.gmra.mxu3 %v187_v8 }
  0xa8   :  { %v589_v9 = vpop.f32.mrf.mxu0 }
  0xa9   :  { %v602_v10 = vpop.f32.mrf.mxu1  ;;  %v590_v18 = vadd.f32 %v1108_v15, %v589_v9 }
  0xab   :  { %v603_v19 = vadd.f32 %v602_v10, %v590_v18 }
  0xb0   :  { %v615_v11 = vpop.f32.mrf.mxu2  ;;  %v591_v13 = vpop.f32.mrf.mxu0 }
  0xb1   :  { %v628_v12 = vpop.f32.mrf.mxu3  ;;  %v604_v14 = vpop.f32.mrf.mxu1  ;;  %v616_v20 = vadd.f32 %v615_v11, %v603_v19 }
  0xb3   :  { %v629_v21 = vadd.f32 %v628_v12, %v616_v20 }
  0xb8   :  { %v617_v16 = vpop.f32.mrf.mxu2 }
  0xb9   :  { %v630_v17 = vpop.f32.mrf.mxu3 }
  0xc8   :  { %v641_v22 = vpop.f32.mrf.mxu0 }
  0xc9   :  { %v654_v23 = vpop.f32.mrf.mxu1  ;;  %v642_v24 = vadd.f32 %v641_v22, %v629_v21 }
  0xcb   :  { %v655_v25 = vadd.f32 %v654_v23, %v642_v24 }
  0xd0   :  { %v667_v26 = vpop.f32.mrf.mxu2  ;;  %v643_v29 = vpop.f32.mrf.mxu0 }
  0xd1   :  { %v680_v27 = vpop.f32.mrf.mxu3  ;;  %v668_v28 = vadd.f32 %v667_v26, %v655_v25  ;;  %v656_v30 = vpop.f32.mrf.mxu1 }
  0xd3   :  { %v681_v31 = vadd.f32 %v680_v27, %v668_v28 }
  0xd5   :  { %v698_v32 = vsel %vm697_vm0, %v681_v31, -inf  ;;  %v685_v33 = vsel %vm684_vm1, %v681_v31, -inf  ;;  %v719_v36 = vsel %vm718_vm2, %v681_v31, -inf }
  0xd6   :  { %699 = vmax.xlane.f32.xlu0 %v698_v32  ;;  %686 = vmax.xlane.f32.xlu2 %v685_v33 }
  0xd8   :  { %v669_v34 = vpop.f32.mrf.mxu2 }
  0xd9   :  { %v682_v35 = vpop.f32.mrf.mxu3 }
  0xde   :  { %720 = vmax.xlane.f32.xlu0 %v719_v36 }
 0x149   :  { %v700_v37 = vpop.xlane.xlu0 %699  ;;  %v687_v45 = vpop.xlane.xlu2 %686 }
 0x14a   :  { %v701_v38 = vsub.f32 %v681_v31, %v700_v37  ;;  %v688_v46 = vsub.f32 %v681_v31, %v687_v45 }
 0x14c   :  { %v702_v39 = vmul.f32 1.442695, %v701_v38  ;;  %v689_v47 = vmul.f32 1.442695, %v688_v46 }
 0x14e   :  { %1109 = vpow2.f32 %v702_v39 }
 0x151   :  { %v721_v40 = vpop.xlane.xlu0 %720 }
 0x152   :  { %v722_v41 = vsub.f32 %v681_v31, %v721_v40 }
 0x154   :  { %v1110_v42 = vpop.eup %1109  ;;  %v723_v43 = vmul.f32 1.442695, %v722_v41 }
 0x155   :  { %705 = vrot.lane.b32.xlu1 %v1110_v42, %s1203_s2 }
 0x156   :  { %1111 = vpow2.f32 %v723_v43 }
 0x157   :  { %1113 = vpow2.f32 %v689_v47 }
 0x15c   :  { %v1112_v44 = vpop.eup %1111 }
 0x15d   :  { %726 = vrot.lane.b32.xlu1 %v1112_v44, %s1201_s22  ;;  %v1114_v48 = vpop.eup %1113 }
 0x15e   :  { %v691_v49 = vsel %vm684_vm1, %v1114_v48, 0.0 }
 0x187   :  { %692 = vadd.xlane.f32.xlu1 %v691_v49 }
 0x1c7   :  { %v706_v50 = vpop.permute.xlu1 %705 }
 0x1c8   :  { %v708_v51 = vsel %vm684_vm1, %v706_v50, 0.0 }
 0x1c9   :  { %709 = vadd.xlane.f32.xlu2 %v708_v51 }
 0x1cf   :  { %v727_v52 = vpop.permute.xlu1 %726 }
 0x1d0   :  { %v729_v53 = vsel %vm684_vm1, %v727_v52, 0.0 }
 0x1d1   :  { %730 = vadd.xlane.f32.xlu0 %v729_v53 }
 0x1fa   :  { %v693_v60 = vpop.xlane.xlu1 %692 }
 0x23c   :  { %v710_v54 = vpop.xlane.xlu2 %709 }
 0x23d   :  { %1115 = vrcp.f32 %v710_v54 }
 0x243   :  { %v1116_v55 = vpop.eup %1115 }
 0x244   :  { %v731_v56 = vpop.xlane.xlu0 %730  ;;  %v712_v57 = vmul.f32 %v1116_v55, %v1110_v42 }
 0x245   :  { %1117 = vrcp.f32 %v731_v56 }
 0x246   :  { %714 = vrot.lane.b32.xlu2 %v712_v57, %s1203_s2  ;;  %1119 = vrcp.f32 %v693_v60 }
 0x24b   :  { %v1118_v58 = vpop.eup %1117 }
 0x24c   :  { %v733_v59 = vmul.f32 %v1118_v58, %v1112_v44  ;;  %v1120_v61 = vpop.eup %1119 }
 0x24d   :  { %v695_v63 = vmul.f32 %v1120_v61, %v1114_v48 }
 0x24e   :  { %735 = vrot.lane.b32.xlu0 %v733_v59, %s1201_s22 }
 0x2a0   :  { %v715_v62 = vpop.permute.xlu2 %714 }
 0x2a1   :  { %v717_v0 = vadd.f32 %v715_v62, %v695_v63 }
 0x2c0   :  { %v736_v1 = vpop.permute.xlu0 %735 }
 0x2c1   :  { %v738_v2 = vadd.f32 %v736_v1, %v717_v0 }
 0x2c3   :  { %v739_v3 = vsel %vm684_vm1, %v738_v2, -inf }
 0x2c4   :  { %740 = vmax.xlane.f32.xlu2 %v739_v3 }
 0x337   :  { %v741_v6 = vpop.xlane.xlu2 %740 }
 0x338   :  { %vm744_vm3 = vcmp.eq.f32.partialorder %v738_v2, %v741_v6 }
 0x339   :  { %v745_v7 = vsel %vm744_vm3, %v743_v5, 1073741824 }
 0x33a   :  { %v746_v8 = vsel %vm684_vm1, %v745_v7, 2147483647 }
 0x33b   :  { %v748_v9 = vshra.s32 %v746_v8, 16  ;;  %v747_v11 = vand.u32 65535, %v746_v8 }
 0x33d   :  { %v750_v10 = vcvt.s32.f32 %v748_v9  ;;  %v749_v13 = vcvt.s32.f32 %v747_v11 }
 0x33f   :  { %751 = vmin.xlane.f32.xlu0 %v750_v10 }
 0x3b2   :  { %v752_v12 = vpop.xlane.xlu0 %751 }
 0x3b3   :  { %vm753_vm4 = vcmp.eq.f32.partialorder %v750_v10, %v752_v12  ;;  %v758_v15 = vcvt.f32.s32 %v752_v12 }
 0x3b4   :  { %v754_v14 = vsel %vm753_vm4, %v749_v13, inf }
 0x3b5   :  { %755 = vmin.xlane.f32.xlu1 %v754_v14  ;;  %v759_v17 = vshll.u32 %v758_v15, 16 }
 0x428   :  { %v756_v16 = vpop.xlane.xlu1 %755 }
 0x429   :  { %v757_v18 = vcvt.f32.s32 %v756_v16 }
 0x42b   :  { %v760_v19 = vadd.s32 %v759_v17, %v757_v18 }
 0x42d   :  { %v761_v20 = vperm.slane %v760_v19, %v743_v5 }
 0x42f   :  { %763 = vst.msk [vmem:[#allocation7] sm:$0x1] %vm762_vm5, %v761_v20 }
 0x430   :  { %774 = dma.vmem_to_hbm [thread:$0]  %s770_s25, 16, %s772_s28, [#allocation4]  }
 0x431   :  { %1197 = dma.done.wait [#allocation4], 16  }
 0x432   :  { %1198 = vsyncadd [#allocation4], 4294967280 }
 0x433   :  { %779 = vsyncpa [#allocation3], 1 }
 0x434   :  { %780 = vsyncpa [#allocation6], 1 }
 0x435   :  { %781 = vsyncpa [#allocation4], 1 }

</bundles_post_ra>
